<compile_context>
chip_gen: v7x
topology: tpu7x:2x2x1
jax: 0.10.0
libtpu: 0.0.40
codegen_flags: <defaults>
</compile_context>

<pallas_src>
import jax
import jax.numpy as jnp
from jax.experimental import pallas as pl
from jax.experimental.pallas import tpu as pltpu


# Below this many bytes the pallas_call / DMA launch overhead dominates; just
# return the lazy slice and let XLA fuse it into whatever consumes it.
_SMALL_SLICE_BYTES = 256 * 1024


def _prefix_dma_kernel(pe_hbm, out_hbm, sem):
    """Single contiguous HBM->HBM DMA of the first seq_len rows of pe."""
    seq_len = out_hbm.shape[0]  # static
    cp = pltpu.make_async_copy(pe_hbm.at[pl.ds(0, seq_len), :], out_hbm, sem)
    cp.start()
    cp.wait()


def _prefix_copy_pallas(pe, seq_len):
    """pe: (max_len, d_model).  Returns (seq_len, d_model) == pe[:seq_len]."""
    _, d_model = pe.shape
    return pl.pallas_call(
        _prefix_dma_kernel,
        out_shape=jax.ShapeDtypeStruct((seq_len, d_model), pe.dtype),
        in_specs=[pl.BlockSpec(memory_space=pl.ANY)],
        out_specs=pl.BlockSpec(memory_space=pl.ANY),
        scratch_shapes=[pltpu.SemaphoreType.DMA(())],
    )(pe)


def learned_positional_embedding_forward(pe, seq_len, *, force_pallas=False):
    """pe: (max_len, d_model) float32.  Returns (1, seq_len, d_model),
    numerically identical to PyTorch's `self.pe[:, :seq_len]`.
    """
    max_len, d_model = pe.shape
    assert 0 < seq_len <= max_len
    n_bytes = seq_len * d_model * jnp.dtype(pe.dtype).itemsize

    if not force_pallas and n_bytes < _SMALL_SLICE_BYTES:
        # Tiny slice: kernel launch would be 100% overhead; return the lazy
        # slice (XLA fuses it into the consumer).
        return pe[None, :seq_len, :]

    out = _prefix_copy_pallas(pe, seq_len)
    return out[None, :, :]


class LearnedPositionalEmbedding2:
    """JAX/Pallas counterpart of the PyTorch module."""

    def __init__(self, d_model, max_len=512, key=None):
        if key is None:
            key = jax.random.PRNGKey(0)
        # torch.nn.init.normal_(pe, std=0.02) on a (1, max_len, d_model) param;
        # stored here as (max_len, d_model), batch-1 axis re-added on output.
        self.pe = 0.02 * jax.random.normal(
            key, (max_len, d_model), dtype=jnp.float32)

    def __call__(self, x, *, force_pallas=False):
        # x: (batch, seq_len, ...) — only x.shape[1] is used, as in PyTorch.
        seq_len = x.shape[1]
        return learned_positional_embedding_forward(
            self.pe, seq_len, force_pallas=force_pallas)


if __name__ == "__main__":
    key = jax.random.PRNGKey(0)
    k_pe1, k_pe2, k_x1, k_x2 = jax.random.split(key, 4)

    # Case 1: small demo shapes, forced through the Pallas DMA kernel.
    d_model, max_len, batch, seq = 32, 512, 2, 8
    mod1 = LearnedPositionalEmbedding2(d_model, max_len=max_len, key=k_pe1)
    x1 = jax.random.normal(k_x1, (batch, seq, d_model), dtype=jnp.float32)
    out1 = jax.block_until_ready(mod1(x1, force_pallas=True))
    ref1 = mod1.pe[None, :seq, :]
    assert out1.shape == (1, seq, d_model), out1.shape
    assert out1.dtype == jnp.float32
    assert jnp.array_equal(out1, ref1), "Pallas output mismatch (case 1)"

    # Case 2: non-multiple-of-8 seq_len through the Pallas DMA kernel
    # (the single contiguous DMA has no (8,128) tiling constraint).
    d_model2, seq2 = 128, 100
    mod2 = LearnedPositionalEmbedding2(d_model2, max_len=max_len, key=k_pe2)
    x2 = jax.random.normal(k_x2, (batch, seq2, d_model2), dtype=jnp.float32)
    out2 = jax.block_until_ready(mod2(x2, force_pallas=True))
    ref2 = mod2.pe[None, :seq2, :]
    assert out2.shape == (1, seq2, d_model2), out2.shape
    assert jnp.array_equal(out2, ref2), "Pallas output mismatch (case 2)"

    # Case 3: default (tiny-slice) fast path — lazy slice, no kernel launch.
    out3 = jax.block_until_ready(mod1(x1))
    assert jnp.array_equal(out3, ref1), "fast-path output mismatch (case 3)"

    print("KERNEL_OK")
</pallas_src>

<mosaic_0001>
module attributes {stable_mosaic.version = 11 : i64} {
  func.func @_prefix_dma_kernel(%arg0: memref<512x32xf32, #tpu.memory_space<any>>, %arg1: memref<8x32xf32, #tpu.memory_space<any>>, %arg2: memref<!tpu.dma_semaphore, #tpu.memory_space<semaphore_mem>>) attributes {dimension_semantics = [], scalar_prefetch = 0 : i64, scratch_operands = 1 : i64, tpu.core_type = #tpu.core_type<tc>} {
    %c0_i32 = arith.constant 0 : i32
    %c0_i32_0 = arith.constant 0 : i32
    %0 = tpu.memref_slice %arg0[%c0_i32, %c0_i32_0] : memref<512x32xf32, #tpu.memory_space<any>> -> memref<8x32xf32, #tpu.memory_space<any>>
    tpu.enqueue_dma source(%0 : memref<8x32xf32, #tpu.memory_space<any>>) target(%arg1 : memref<8x32xf32, #tpu.memory_space<any>>) target_semaphore(%arg2 : memref<!tpu.dma_semaphore, #tpu.memory_space<semaphore_mem>>)
    %c0_i32_1 = arith.constant 0 : i32
    %c0_i32_2 = arith.constant 0 : i32
    %1 = tpu.memref_slice %arg0[%c0_i32_1, %c0_i32_2] : memref<512x32xf32, #tpu.memory_space<any>> -> memref<8x32xf32, #tpu.memory_space<any>>
    tpu.wait_dma2 semaphore(%arg2 : memref<!tpu.dma_semaphore, #tpu.memory_space<semaphore_mem>>) src(%1 : memref<8x32xf32, #tpu.memory_space<any>>) dst(%arg1 : memref<8x32xf32, #tpu.memory_space<any>>)
    return
  }
}

</mosaic_0001>

<bundles_post_ra>
// kernel: tpu_custom_call.1
= control target key start
LH: loop header
LB: loop body
LE: loop exit
PB: predicated region body
PF: predicated region fallthrough
CT: control target
= control target key end

     0   :  { %s76_s0 = inlined_call_operand.vmem [shape: f32[512,32], index: 0, kind: input, shape index: {}]   ;;  %s77_s1 = inlined_call_operand.hbm [shape: f32[8,32], index: 1, kind: output, shape index: {}]  }
   0x1   :  { %s13_s8 = sshll.u32 %s76_s0, 4  ;;  %s14_s8 = int_to_ptr.vmem [resolvable:$true] %s13_s8 }
   0x2   :  { %s27_s9 = scalar_lea.vmem %s14_s8, 128  ;;  %s31_s10 = scalar_lea.vmem %s14_s8, 8192 }
   0x3   :  { %p28_p0 = scmp.ne.s32.totalorder %s14_s8, %s27_s9  ;;  %p32_p1 = scmp.lt.s32.totalorder %s14_s8, %s14_s8 }
   0x4   :  { %p33_p2 = scmp.lt.s32.totalorder %s31_s10, %s27_s9 }
   0x6   :  { %p34_p3 = por %p33_p2, %p32_p1 }
   0x8   :  { %p35_p4 = pnand %p34_p3, %p28_p0 }
   0xa   :  { %38 = shalt.err (!%p35_p4)  }
   0xb   :  { %s39_s13 = scalar_lea.hbm %s77_s1, 128 }
   0xc   :  { %p40_p5 = scmp.ne.s32.totalorder %s77_s1, %s39_s13  ;;  %p43_p6 = scmp.lt.u32.totalorder %s39_s13, %s77_s1 }
   0xe   :  { %p45_p7 = pnand %p43_p6, %p40_p5 }
  0x10   :  { %48 = shalt.err (!%p45_p7)  }
  0x11   :  { %16 = dma.vmem_to_hbm [thread:$0]  %s14_s8, 128, %s77_s1, [#allocation2] }
  0x12   :  { %49 = dma.done.wait [#allocation2], 128 }
  0x13   :  { %50 = vsyncadd [#allocation2], 4294967168 }
  0x14   :  { %20 = vsyncmov [#allocation2] }
  0x17   :  { %s21_s19 = vpop.sfrf %20 }
  0x18   :  { %p26_p8 = scmp.ne.s32.totalorder %s21_s19, 0 }
  0x1a   :  { %25 = shalt.err (%p26_p8)  }

</bundles_post_ra>
